<compile_context>
chip_gen: v6e
topology: v6e:2x2x1
jax: 0.10.0
libtpu: 0.0.40
codegen_flags: <defaults>
</compile_context>

<pallas_src>
import functools

import jax
import jax.numpy as jnp
from jax import lax
from jax.experimental import pallas as pl
from jax.experimental.pallas import tpu as pltpu


def _zero_fill_kernel(o_ref):
    # Write-only: the drop path never reads the input tensor.
    o_ref[...] = jnp.zeros_like(o_ref)


def _lane_dense_shape(total, max_cols=32768):
    """Pick (rows, cols) with cols the largest multiple of 128 (<= max_cols)
    that divides total.  Returns None if total is not divisible by 128."""
    if total % 128 != 0:
        return None
    cols = 128
    while cols * 2 <= max_cols and total % (cols * 2) == 0:
        cols *= 2
    return total // cols, cols


def _pallas_zeros(shape, dtype, *, target_block_bytes=4 * 1024 * 1024):
    """zeros(shape, dtype) produced by a tiled, write-only Pallas kernel."""
    total = 1
    for d in shape:
        total *= int(d)

    rc = _lane_dense_shape(total)
    if rc is None:
        # Lane-sparse fallback for sizes not divisible by 128: one full block
        # (block_shape == full array dims, so the (8,128) rule is satisfied).
        rows, cols = 1, total
    else:
        rows, cols = rc

    itemsize = jnp.dtype(dtype).itemsize
    # Sublane packing: 8 rows per vreg tile at 32-bit, 16 at 16-bit, 32 at 8-bit.
    sublane = max(8, (8 * 4) // max(1, itemsize))

    if rows <= sublane:
        block_rows = rows                          # full extent along rows
    else:
        br = max(sublane, target_block_bytes // (cols * itemsize))
        br = min(br, rows)
        block_rows = max(sublane, (br // sublane) * sublane)

    grid = (pl.cdiv(rows, block_rows),)

    out2 = pl.pallas_call(
        _zero_fill_kernel,
        out_shape=jax.ShapeDtypeStruct((rows, cols), dtype),
        grid=grid,
        out_specs=pl.BlockSpec((block_rows, cols), lambda i: (i, 0)),
        compiler_params=pltpu.CompilerParams(
            dimension_semantics=("parallel",),     # shard across v7x's 2 TCs
        ),
    )()
    return out2.reshape(shape)


def dropblock_forward(x, key, *, drop_prob=0.1, block_size=3, training=True):
    """Pallas/JAX implementation of DropBlock.forward.

    x   : (N, C, H, W) array (NCHW, matching the PyTorch module)
    key : jax PRNG key standing in for torch.rand(1)'s RNG state
          (pass a fresh key per call for fresh randomness, like torch).
    """
    del block_size  # stored but unused by the reference forward pass
    if (not training) or drop_prob == 0:
        return x

    # Single uniform scalar decides keep-all vs drop-all (== torch.rand(1)).
    u = jax.random.uniform(key, (), dtype=jnp.float32)
    keep = u > jnp.float32(drop_prob)

    # Keep path (prob 1-p): x is returned untouched (no extra HBM reads).
    # Drop path (prob p): write-only Pallas zero-fill, x is never read.
    return lax.cond(keep,
                    lambda: x,
                    lambda: _pallas_zeros(x.shape, x.dtype))


if __name__ == "__main__":
    key = jax.random.PRNGKey(0)
    xkey, dkey = jax.random.split(key)
    x = jax.random.normal(xkey, (2, 4, 16, 16), dtype=jnp.float32)

    # Training-mode forward (compiles both branches; runs the taken one).
    fwd = jax.jit(functools.partial(
        dropblock_forward, drop_prob=0.1, block_size=3, training=True))
    y = jax.block_until_ready(fwd(x, dkey))
    kept = bool(jnp.all(y == x))
    dropped = bool(jnp.all(y == 0))
    assert kept or dropped, "DropBlock output must be all-pass or all-zero"
    assert y.shape == x.shape and y.dtype == x.dtype

    # Force the drop branch (u < 1.0 always, so u > drop_prob=1.0 is false) so
    # the Pallas zero-fill kernel is guaranteed to execute at least once.
    fwd_drop = jax.jit(functools.partial(
        dropblock_forward, drop_prob=1.0, block_size=3, training=True))
    y_drop = jax.block_until_ready(fwd_drop(x, dkey))
    assert bool(jnp.all(y_drop == 0))
    assert y_drop.shape == x.shape and y_drop.dtype == x.dtype

    # Also exercise the zero-fill on a lane-sparse (not %128) size.
    x_odd = jax.random.normal(xkey, (3, 5, 7), dtype=jnp.float32)
    y_odd = jax.block_until_ready(jax.jit(functools.partial(
        dropblock_forward, drop_prob=1.0, training=True))(x_odd, dkey))
    assert bool(jnp.all(y_odd == 0)) and y_odd.shape == x_odd.shape

    # Eval-mode / drop_prob == 0 path is identity.
    y_eval = dropblock_forward(x, dkey, drop_prob=0.1, training=False)
    assert bool(jnp.all(y_eval == x))

    print("KERNEL_OK")
</pallas_src>

<mosaic_0001>
module attributes {stable_mosaic.version = 11 : i64} {
  func.func @_zero_fill_kernel(%arg0: i32, %arg1: memref<1x2048xf32, #tpu.memory_space<vmem>>) attributes {dimension_semantics = [#tpu.dimension_semantics<parallel>], iteration_bounds = array<i64: 1>, scalar_prefetch = 0 : i64, scratch_operands = 0 : i64, tpu.core_type = #tpu.core_type<tc>, window_params = [{transform_indices = @transform_0, window_bounds = array<i64: 1, 2048>}]} {
    %cst = arith.constant 0.000000e+00 : f32
    %0 = vector.broadcast %cst : f32 to vector<1x2048xf32>
    %c0 = arith.constant 0 : index
    %c0_0 = arith.constant 0 : index
    %1 = vector.load %arg1[%c0, %c0_0] : memref<1x2048xf32, #tpu.memory_space<vmem>>, vector<1x2048xf32>
    tpu.vector_store %arg1[%c0, %c0_0], %0 {strides = array<i32>} : memref<1x2048xf32, #tpu.memory_space<vmem>>, vector<1x2048xf32>,
    return
  }
  func.func @transform_0(%arg0: i32) -> (i32, i32) {
    %c0_i32 = arith.constant 0 : i32
    %c0_i32_0 = arith.constant 0 : i32
    return %arg0, %c0_i32 : i32, i32
  }
}

</mosaic_0001>

<bundles_post_ra>
// kernel: branch_0_fun.1
= control target key start
LH: loop header
LB: loop body
LE: loop exit
PB: predicated region body
PF: predicated region fallthrough
CT: control target
= control target key end

     0   :  { %v12_v0 = vmov 0.0   ;;  %s24_s0 = inlined_call_operand.vmem [shape: f32[1,2048], index: 0, kind: output, shape index: {}]  }
   0x1   :  { %5 = vst [vmem:[%s24_s0] sm:$0xff] %v12_v0  ;;  %6 = vst [vmem:[%s24_s0 + $0x8] sm:$0xff] %v12_v0 }

</bundles_post_ra>
